<compile_context>
chip_gen: v7x
topology: tpu7x:2x2x1
jax: 0.10.0
libtpu: 0.0.40
codegen_flags: <defaults>
</compile_context>

<pallas_src>
import jax
import jax.numpy as jnp
from jax.experimental import pallas as pl
from jax.experimental.pallas import tpu as pltpu


def _ls_partial_kernel(off_value, conf_minus_off, n_rows, block_rows):
    """Per-block partial of:  sum_r [lse(x_r) - off*sum_c x_rc] - (conf-off)*sum_r x_{r,t_r}."""

    def kernel(pred_ref, xt_ref, out_ref):
        i = pl.program_id(0)

        x = pred_ref[...].astype(jnp.float32)                  # (TM, C)
        tm, _ = x.shape

        m = jnp.max(x, axis=-1, keepdims=True)                  # (TM, 1)
        lse = m + jnp.log(jnp.sum(jnp.exp(x - m), axis=-1, keepdims=True))
        row_sum = jnp.sum(x, axis=-1, keepdims=True)             # (TM, 1)

        per_row = lse - jnp.float32(off_value) * row_sum          # (TM, 1)

        # Mask rows of the (possibly padded) last tile.
        row = jax.lax.broadcasted_iota(jnp.int32, (tm, 1), 0) + i * block_rows
        per_row = jnp.where(row < n_rows, per_row, 0.0)

        part = jnp.sum(per_row, axis=0, keepdims=True)            # (1, 1)

        # Target-logit term: lane-dense (1,1,TM), zero-padded by the wrapper.
        xt_sum = jnp.sum(xt_ref[...], axis=-1, keepdims=True)     # (1, 1, 1)
        part3 = part[None] - jnp.float32(conf_minus_off) * xt_sum  # (1, 1, 1)

        out_ref[...] = jnp.broadcast_to(part3, (1, 1, 128))

    return kernel


def _vmem_capacity_bytes():
    try:
        info = pltpu.get_tpu_info()
        cap = getattr(info, "vmem_capacity_bytes", None)
        if cap:
            return int(cap)
    except Exception:
        pass
    return 64 * 1024 * 1024  # conservative: v7x per-TensorCore VMEM


def _choose_block_rows(n, c, itemsize, vmem_capacity):
    """Row tile sized in bytes: double-buffered pred + f32 intermediates + xt
    targeted at ~half the generation's VMEM capacity."""
    align = 16 if itemsize < 4 else 8
    # per-row VMEM bytes: 2x pred block (double buffer) + ~3 f32 intermediates
    # (x_f32 / x-m / exp) + 2x lane-dense xt block (8-sublane padded f32).
    per_row = 2 * c * itemsize + 3 * c * 4 + 2 * 32
    budget = vmem_capacity // 2
    tm = budget // per_row
    if tm >= n:
        return n                                  # full-dim block is always legal
    if tm < align:
        # TODO(synk): stream the class axis with an online logsumexp instead.
        raise NotImplementedError(
            "num_classes too large for a single class-axis block on this chip; "
            "class-axis streaming (online logsumexp) is not implemented.")
    return max(align, (tm // align) * align)


def label_smoothing_loss(pred, target, *, num_classes, smoothing=0.0,
                         block_rows=None):
    """pred: (N, C) float (f32 or bf16 -- pass bf16 when available, the op is
    HBM-bound), target: (N,) int class ids.  Returns scalar f32 loss."""
    n, c = pred.shape
    assert c == num_classes, (c, num_classes)
    assert num_classes >= 2, "num_classes must be >= 2 (off-value divides by C-1)"

    confidence = 1.0 - smoothing
    off = smoothing / (num_classes - 1)

    # Target-logit gather: N elements (vs N*C streamed by the kernel).
    tgt = target.astype(jnp.int32)
    xt = jnp.take_along_axis(pred, tgt[:, None], axis=1)[:, 0].astype(jnp.float32)

    itemsize = jnp.dtype(pred.dtype).itemsize
    vmem_cap = _vmem_capacity_bytes()
    if block_rows is None:
        block_rows = _choose_block_rows(n, c, itemsize, vmem_cap)
    tm = int(block_rows)
    nb = int(pl.cdiv(n, tm))

    pad = nb * tm - n
    if pad:
        xt = jnp.pad(xt, (0, pad))                 # zeros -> contribute 0 to the sum
    xt3 = xt.reshape(nb, 1, tm)

    vmem_limit = int(min(vmem_cap * 3 // 4, 100 * 1024 * 1024))

    partials = pl.pallas_call(
        _ls_partial_kernel(off, confidence - off, n, tm),
        out_shape=jax.ShapeDtypeStruct((nb, 1, 128), jnp.float32),
        grid=(nb,),
        in_specs=[
            pl.BlockSpec((tm, c), lambda i: (i, 0)),
            pl.BlockSpec((1, 1, tm), lambda i: (i, 0, 0)),
        ],
        out_specs=pl.BlockSpec((1, 1, 128), lambda i: (i, 0, 0)),
        compiler_params=pltpu.CompilerParams(
            dimension_semantics=("parallel",),
            vmem_limit_bytes=vmem_limit,
        ),
    )(pred, xt3)

    return jnp.sum(partials[:, 0, 0]) / jnp.float32(n)


def _reference(pred, target, num_classes, smoothing):
    logp = jax.nn.log_softmax(pred.astype(jnp.float32), axis=-1)
    confidence = 1.0 - smoothing
    off = smoothing / (num_classes - 1)
    true_dist = jnp.full_like(logp, off)
    true_dist = true_dist.at[jnp.arange(pred.shape[0]), target].set(confidence)
    return jnp.mean(jnp.sum(-true_dist * logp, axis=-1))


if __name__ == "__main__":
    key = jax.random.PRNGKey(0)
    k1, k2 = jax.random.split(key)

    batch = 20                 # deliberately not a multiple of the row tile
    num_classes = 32
    smoothing = 0.1

    pred = jax.random.normal(k1, (batch, num_classes), dtype=jnp.float32)
    target = jax.random.randint(k2, (batch,), 0, num_classes, dtype=jnp.int32)

    # Multi-block path: forced small row tile -> 3 grid steps, partial last
    # block exercises the row mask and the xt zero-padding.
    loss_multi = label_smoothing_loss(pred, target, num_classes=num_classes,
                                      smoothing=smoothing, block_rows=8)
    # Auto-tiled path: byte-based tile selection (single full-dim block here).
    loss_auto = label_smoothing_loss(pred, target, num_classes=num_classes,
                                     smoothing=smoothing)
    loss_multi, loss_auto = jax.block_until_ready((loss_multi, loss_auto))

    ref = _reference(pred, target, num_classes, smoothing)
    assert jnp.allclose(loss_multi, ref, atol=1e-5, rtol=1e-5), (loss_multi, ref)
    assert jnp.allclose(loss_auto, ref, atol=1e-5, rtol=1e-5), (loss_auto, ref)

    print("KERNEL_OK")
</pallas_src>

<mosaic_0001>
module attributes {stable_mosaic.version = 11 : i64} {
  func.func @kernel(%arg0: i32, %arg1: memref<8x32xf32, #tpu.memory_space<vmem>>, %arg2: memref<1x1x8xf32, #tpu.memory_space<vmem>>, %arg3: memref<1x1x128xf32, #tpu.memory_space<vmem>>) attributes {dimension_semantics = [#tpu.dimension_semantics<parallel>], iteration_bounds = array<i64: 3>, scalar_prefetch = 0 : i64, scratch_operands = 0 : i64, tpu.core_type = #tpu.core_type<tc>, window_params = [{transform_indices = @transform_0, window_bounds = array<i64: 8, 32>}, {transform_indices = @transform_1, window_bounds = array<i64: 1, 1, 8>}, {transform_indices = @transform_2, window_bounds = array<i64: 1, 1, 128>}]} {
    %c0 = arith.constant 0 : index
    %c0_0 = arith.constant 0 : index
    %0 = vector.load %arg1[%c0, %c0_0] : memref<8x32xf32, #tpu.memory_space<vmem>>, vector<8x32xf32>
    %cst = arith.constant dense<0xFF800000> : vector<8xf32>
    %1 = vector.multi_reduction <maximumf>, %0, %cst [1] : vector<8x32xf32> to vector<8xf32>
    %2 = vector.shape_cast %1 : vector<8xf32> to vector<8x1xf32>
    %3 = vector.broadcast %2 : vector<8x1xf32> to vector<8x32xf32>
    %4 = arith.subf %0, %3 : vector<8x32xf32>
    %5 = math.exp %4 : vector<8x32xf32>
    %cst_1 = arith.constant dense<0.000000e+00> : vector<8xf32>
    %6 = vector.multi_reduction <add>, %5, %cst_1 [1] : vector<8x32xf32> to vector<8xf32>
    %7 = vector.shape_cast %6 : vector<8xf32> to vector<8x1xf32>
    %8 = math.log %7 : vector<8x1xf32>
    %9 = arith.addf %2, %8 : vector<8x1xf32>
    %cst_2 = arith.constant dense<0.000000e+00> : vector<8xf32>
    %10 = vector.multi_reduction <add>, %0, %cst_2 [1] : vector<8x32xf32> to vector<8xf32>
    %11 = vector.shape_cast %10 : vector<8xf32> to vector<8x1xf32>
    %cst_3 = arith.constant 0.0032258064 : f32
    %12 = vector.broadcast %cst_3 : f32 to vector<8x1xf32>
    %13 = arith.mulf %12, %11 : vector<8x1xf32>
    %14 = arith.subf %9, %13 : vector<8x1xf32>
    %15 = tpu.iota {dimensions = array<i32: 0>} : vector<8x1xi32>
    %c8_i32 = arith.constant 8 : i32
    %16 = arith.muli %arg0, %c8_i32 : i32
    %17 = vector.broadcast %16 : i32 to vector<8x1xi32>
    %18 = arith.addi %15, %17 : vector<8x1xi32>
    %c20_i32 = arith.constant 20 : i32
    %19 = vector.broadcast %c20_i32 : i32 to vector<8x1xi32>
    %20 = arith.cmpi slt, %18, %19 : vector<8x1xi32>
    %cst_4 = arith.constant 0.000000e+00 : f32
    %21 = vector.broadcast %cst_4 : f32 to vector<8x1xf32>
    %22 = arith.select %20, %14, %21 : vector<8x1xi1>, vector<8x1xf32>
    %cst_5 = arith.constant dense<0.000000e+00> : vector<1xf32>
    %23 = vector.multi_reduction <add>, %22, %cst_5 [0] : vector<8x1xf32> to vector<1xf32>
    %24 = vector.shape_cast %23 : vector<1xf32> to vector<1x1xf32>
    %c0_6 = arith.constant 0 : index
    %c0_7 = arith.constant 0 : index
    %c0_8 = arith.constant 0 : index
    %25 = vector.load %arg2[%c0_6, %c0_7, %c0_8] : memref<1x1x8xf32, #tpu.memory_space<vmem>>, vector<1x1x8xf32>
    %cst_9 = arith.constant dense<0.000000e+00> : vector<1x1xf32>
    %26 = vector.multi_reduction <add>, %25, %cst_9 [2] : vector<1x1x8xf32> to vector<1x1xf32>
    %27 = vector.shape_cast %26 : vector<1x1xf32> to vector<1x1x1xf32>
    %28 = vector.shape_cast %24 : vector<1x1xf32> to vector<1x1x1xf32>
    %cst_10 = arith.constant 0.896774172 : f32
    %29 = vector.broadcast %cst_10 : f32 to vector<1x1x1xf32>
    %30 = arith.mulf %29, %27 : vector<1x1x1xf32>
    %31 = arith.subf %28, %30 : vector<1x1x1xf32>
    %32 = vector.shape_cast %31 : vector<1x1x1xf32> to vector<1x1x1xf32>
    %33 = vector.broadcast %32 : vector<1x1x1xf32> to vector<1x1x128xf32>
    %c0_11 = arith.constant 0 : index
    %c0_12 = arith.constant 0 : index
    %c0_13 = arith.constant 0 : index
    %34 = vector.load %arg3[%c0_11, %c0_12, %c0_13] : memref<1x1x128xf32, #tpu.memory_space<vmem>>, vector<1x1x128xf32>
    tpu.vector_store %arg3[%c0_11, %c0_12, %c0_13], %33 {strides = array<i32>} : memref<1x1x128xf32, #tpu.memory_space<vmem>>, vector<1x1x128xf32>,
    return
  }
  func.func @transform_0(%arg0: i32) -> (i32, i32) {
    %c0_i32 = arith.constant 0 : i32
    %c0_i32_0 = arith.constant 0 : i32
    return %arg0, %c0_i32 : i32, i32
  }
  func.func @transform_1(%arg0: i32) -> (i32, i32, i32) {
    %c0_i32 = arith.constant 0 : i32
    %c0_i32_0 = arith.constant 0 : i32
    %c0_i32_1 = arith.constant 0 : i32
    return %arg0, %c0_i32, %c0_i32_0 : i32, i32, i32
  }
  func.func @transform_2(%arg0: i32) -> (i32, i32, i32) {
    %c0_i32 = arith.constant 0 : i32
    %c0_i32_0 = arith.constant 0 : i32
    %c0_i32_1 = arith.constant 0 : i32
    return %arg0, %c0_i32, %c0_i32_0 : i32, i32, i32
  }
}

</mosaic_0001>

<bundles_post_ra>
// kernel: tpu_custom_call.1
= control target key start
LH: loop header
LB: loop body
LE: loop exit
PB: predicated region body
PF: predicated region fallthrough
CT: control target
= control target key end

     0   :  { %7 = vsyncpa [#allocation3], 0  ;;  %s645_s0 = inlined_call_operand.hbm [shape: f32[20,32], index: 0, kind: input, shape index: {}]   ;;  %s646_s1 = inlined_call_operand.vmem [shape: f32[3,1,8], index: 1, kind: input, shape index: {}]   ;;  %s647_s2 = inlined_call_operand.hbm [shape: f32[3,1,128], index: 2, kind: output, shape index: {}]  }
   0x1   :  { %9 = vsyncpa [#allocation3 + $0x1], 0 }
   0x2   :  { %10 = vsyncpa [#allocation4], 0 }
   0x3   :  { %12 = vsyncpa [#allocation4 + $0x1], 0  ;;  %s476_s9 = smov 0   ;;  %s478_s10 = smov 0  }
   0x4   :  { %s480_s11 = smov 0   ;;  %s482_s12 = smov 0  }
   0x5 LB: > { %s497_s13 = sadd.s32 4294967295, %s457_s12   ;;  %s300_s14 = sadd.s32 4294967294, %s457_s12   ;;  %s457_s12 = sphi %s482_s12, %s661_s12   ;;  %s453_s11 = sphi %s480_s11, %s660_s11   ;;  %s449_s10 = sphi %s478_s10, %s659_s10   ;;  %s445_s9 = sphi %s476_s9, %s658_s9  }
   0x6   : > { %s501_s15 = sadd.s32 1, %s457_s12   ;;  %s25_s16 = sadd.s32 1, %s453_s11 }
   0x7   : > { %s22_s17 = ssub.s32 %s457_s12, %s501_s15  ;;  %p32_p0 = scmp.ne.s32.totalorder %s453_s11, %s449_s10 }
   0x8   : > { %p23_p1 = scmp.eq.s32.totalorder %s22_s17, 0  ;;  %p33_p2 = scmp.eq.s32.totalorder %s457_s12, 0 }
   0x9   : > { %p38_p3 = scmp.ne.s32.totalorder %s449_s10, %s445_s9  ;;  %p39_p4 = scmp.eq.s32.totalorder %s497_s13, 0 }
   0xa   : > { %s513_s18 = scalar_select %p23_p1, %s453_s11, %s25_s16  }
   0xb   : > { %p515_p5 = por %p33_p2, %p32_p0  ;;  %p519_p6 = por %p39_p4, %p38_p3 }
   0xc   : > { %p88_p7 = scmp.eq.s32.totalorder %s497_s13, 2  ;;  %p94_p8 = scmp.eq.s32.totalorder %s300_s14, 2 }
   0xd   : > { %p323_p9 = scmp.lt.s32.totalorder %s457_s12, 3  ;;  %s114_s23 = sand.u32 1, %s453_s11  }
   0xe   : > { %p525_p10 = por %p88_p7, %p32_p0  ;;  %p529_p11 = por %p94_p8, %p38_p3 }
   0xf   : > { %s304_s24 = sshll.u32 %s457_s12, 7  ;;  %s303_s25 = sshll.u32 %s114_s23, 3 }
  0x10   : > { %s651_s21 = scalar_select %p525_p10, 1, 0 }
  0x11   : > { %s652_s22 = scalar_select %p529_p11, 1, 0 }
  0x12   : > { %s538_s28 = scalar_lea.hbm %s645_s0, %s304_s24  ;;  %s118_s29 = scalar_lea.vmem [#allocation2], %s303_s25 }
  0x13   : > { %s125_s30 = sshll.u32 %s118_s29, 4  ;;  %p542_p12 = pnand %p323_p9, %p515_p5  ;;  %s546_s30 = int_to_ptr.vmem [resolvable:$true] %s125_s30 }
  0x14   : > { %s115_s4 = scalar_lea.sflag [#allocation3], %s114_s23  ;;  %s361_s5 = scalar_lea.hbm %s538_s28, 128 }
  0x15   : > { %p362_p1 = scmp.ne.s32.totalorder %s538_s28, %s361_s5  ;;  %p363_p2 = pneg %p542_p12 }
  0x16   : > { %s366_s8 = scalar_lea.hbm %s645_s0, 384  ;;  %p367_p5 = scmp.lt.u32.totalorder %s538_s28, %s645_s0 }
  0x17   : > { %p364_p3 = pnand %p363_p2, %p362_p1  ;;  %p368_p7 = scmp.lt.u32.totalorder %s366_s8, %s361_s5 }
  0x18   : > { %p370_p9 = scmp.lt.u32.totalorder %s361_s5, %s538_s28 }
  0x19   : > { %p365_p4 = pneg %p364_p3  ;;  %p369_p8 = por %p368_p7, %p367_p5 }
  0x1b   : > { %p371_p13 = por %p370_p9, %p369_p8 }
  0x1d   : > { %p372_p0 = pnand %p371_p13, %p365_p4 }
  0x1f   : > { %375 = shalt.err (!%p372_p0)
}
  0x20   : > { %s376_s17 = scalar_lea.vmem %s546_s30, 128  ;;  %s459_s19 = smov [#allocation2]  }
  0x21   : > { %p377_p1 = scmp.ne.s32.totalorder %s546_s30, %s376_s17  ;;  %s381_s23 = sshll.u32 %s459_s19, 4  ;;  %s382_s23 = int_to_ptr.vmem [resolvable:$false] %s381_s23 }
  0x22   : > { %s383_s24 = scalar_lea.vmem %s382_s23, 256  ;;  %p384_p10 = scmp.lt.s32.totalorder %s546_s30, %s382_s23 }
  0x23   : > { %p379_p3 = pnand %p377_p1, %p363_p2  ;;  %p385_p5 = scmp.lt.s32.totalorder %s383_s24, %s376_s17 }
  0x25   : > { %p380_p11 = pneg %p379_p3  ;;  %p386_p7 = por %p385_p5, %p384_p10 }
  0x27   : > { %p387_p8 = pnand %p386_p7, %p380_p11 }
  0x29   : > { %390 = shalt.err (!%p387_p8)
}
  0x2a   : > { %318 = dma.hbm_to_vmem [thread:$0]  (!%p542_p12), %s538_s28, 128, %s546_s30, %s115_s4  }
  0x2b   : > { %p654_p13 = scmp.lt.s32.totalorder %s457_s12, 4  ;;  %p655_p0 = scmp.ge.s32.totalorder %s457_s12, 1 }
  0x2d   : > { %p137_p2 = pnand %p655_p0, %p654_p13 }
  0x2e   : > { %s580_s25 = sand.u32 (!%p137_p2), 1, %s449_s10  }
  0x2f   : > { %140 = sbr.rel (%p137_p2) target bundleno = 403 (0x193), region = 28  ;;  %s306_s26 = sshll.u32 (!%p137_p2), %s580_s25, 3 }
  0x30   : > { %s143_s27 = scalar_lea.sflag (!%p137_p2), [#allocation3], %s580_s25  ;;  %s146_s29 = scalar_lea.vmem (!%p137_p2), [#allocation2], %s306_s26 }
  0x36   : > { %436 = dma.done.wait (%p519_p6), %s143_s27, 128  }
  0x37   : > { %438 = vsyncadd (%p519_p6), %s143_s27, 4294967168  ;;  %vm173_vm0 = vcmask 261120   ;;  %v172_v0 = vld [vmem:[%s146_s29] sm:$0xff]  ;;  %p169_p10 = scmp.lt.s32.totalorder %s497_s13, 2  ;;  %vm205_vm1 = vcmask 57344   ;;  %v191_v11 = vlaneseq  ;;  %s307_s20 = sshll.u32 %s497_s13, 3 }
  0x38   : > { %v174_v1 = vsel %vm173_vm0, %v172_v0, -inf  ;;  %v186_v2 = vsel %vm173_vm0, %v172_v0, 0.0  ;;  %v194_v13 = vstv %s307_s20  ;;  %s308_s5 = sshll.u32 %s497_s13, 4  ;;  %s168_s6 = scalar_lea.vmem [#allocation5], %s580_s25 }
  0x39   : > { %175 = vmax.xlane.f32.xlu0 %v174_v1  ;;  %187 = vadd.xlane.f32.xlu1 %v186_v2  ;;  %s170_s28 = scalar_select %p169_p10, %s497_s13, 2  ;;  %v192_v12 = vshrl.u32 %v191_v11, 7 }
  0x3a   : > { %s225_s7 = sshll.u32 %s168_s6, 4  ;;  %s602_s16 = scalar_lea.hbm %s647_s2, %s308_s5  ;;  %s604_s7 = int_to_ptr.vmem [resolvable:$true] %s225_s7 }
  0x3b   : > { %s171_s4 = scalar_lea.vmem %s646_s1, %s170_s28  ;;  %v195_v16 = vadd.s32 %v194_v13, %v192_v12  ;;  %s213_s17 = scalar_lea.sflag [#allocation4], %s580_s25 }
  0x3c   : > { %v204_v3 = vld [vmem:[%s171_s4] sm:$0x1]  ;;  %s391_s19 = scalar_lea.vmem %s604_s7, 16  ;;  %p656_p11 = scmp.ne.s32.totalorder %s651_s21, 0 }
  0x3d   : > { %v206_v4 = vsel %vm205_vm1, %v204_v3, 0.0  ;;  %vm196_vm2 = vcmp.lt.s32.totalorder %v195_v16, 20  ;;  %p392_p6 = scmp.ne.s32.totalorder %s604_s7, %s391_s19  ;;  %s460_s13 = smov [#allocation5]  }
  0x3e   : > { %207 = vadd.xlane.f32.xlu1 %v206_v4  ;;  %s395_s23 = sshll.u32 %s460_s13, 4  ;;  %s396_s23 = int_to_ptr.vmem [resolvable:$false] %s395_s23 }
  0x3f   : > { %p393_p12 = pnand %p392_p6, %p656_p11  ;;  %s397_s24 = scalar_lea.vmem %s396_s23, 32 }
  0x40   : > { %p398_p9 = scmp.lt.s32.totalorder %s604_s7, %s396_s23  ;;  %p399_p1 = scmp.lt.s32.totalorder %s397_s24, %s391_s19 }
  0x41   : > { %p394_p4 = pneg %p393_p12 }
  0x42   : > { %p400_p3 = por %p399_p1, %p398_p9 }
  0x44   : > { %p401_p5 = pnand %p400_p3, %p394_p4 }
  0xc6   : > { %v176_v5 = vpop.xlane.xlu0 %175  ;;  %v188_v14 = vpop.xlane.xlu1 %187 }
  0xc7   : > { %v177_v6 = vsub.f32 %v172_v0, %v176_v5  ;;  %v189_v18 = vmul.f32 0.0032258064, %v188_v14 }
  0xc9   : > { %v178_v7 = vmul.f32 1.442695, %v177_v6 }
  0xcb   : > { %357 = vpow2.f32 %v178_v7  ;;  %v208_v25 = vpop.xlane.xlu1 %207 }
  0xcc   : > { %v209_v28 = vmul.f32 0.8967742, %v208_v25 }
  0xd5   : > { %v358_v8 = vpop.eup %357 }
  0xd6   : > { %v180_v9 = vsel %vm173_vm0, %v358_v8, 0.0 }
  0xd7   : > { %181 = vadd.xlane.f32.xlu0 %v180_v9 }
 0x164   : > { %v182_v10 = vpop.xlane.xlu0 %181 }
 0x165   : > { %359 = vlog2.f32 %v182_v10 }
 0x16f   : > { %v360_v15 = vpop.eup %359 }
 0x170   : > { %v184_v17 = vmul.f32 0.6931472, %v360_v15 }
 0x172   : > { %v185_v19 = vadd.f32 %v184_v17, %v176_v5 }
 0x174   : > { %v190_v20 = vsub.f32 %v185_v19, %v189_v18 }
 0x176   : > { %v197_v21 = vsel %vm196_vm2, %v190_v20, 0.0 }
 0x177   : > { %v198_v22 = vrot.slane %v197_v21, 4 }
 0x179   : > { %v199_v23 = vadd.f32 %v198_v22, %v197_v21 }
 0x17b   : > { %v200_v24 = vrot.slane %v199_v23, 2 }
 0x17d   : > { %v201_v26 = vadd.f32 %v200_v24, %v199_v23 }
 0x17f   : > { %v202_v27 = vrot.slane %v201_v26, 1 }
 0x181   : > { %v203_v29 = vadd.f32 %v202_v27, %v201_v26 }
 0x183   : > { %v210_v30 = vsub.f32 %v203_v29, %v209_v28 }
 0x185   : > { %211 = vst [vmem:[%s168_s6] sm:$0x1] %v210_v30 }
 0x186   : > { %404 = shalt.err (!%p401_p5)
}
 0x187   : > { %s405_s25 = scalar_lea.hbm %s602_s16, 16  ;;  %s409_s29 = scalar_lea.hbm %s647_s2, 48 }
 0x188   : > { %p406_p7 = scmp.ne.s32.totalorder %s602_s16, %s405_s25  ;;  %p410_p0 = scmp.lt.u32.totalorder %s602_s16, %s647_s2 }
 0x189   : > { %p411_p2 = scmp.lt.u32.totalorder %s409_s29, %s405_s25  ;;  %p413_p6 = scmp.lt.u32.totalorder %s405_s25, %s602_s16 }
 0x18a   : > { %p407_p8 = pnand %p406_p7, %p656_p11 }
 0x18b   : > { %p412_p10 = por %p411_p2, %p410_p0 }
 0x18c   : > { %p408_p13 = pneg %p407_p8 }
 0x18d   : > { %p414_p12 = por %p413_p6, %p412_p10 }
 0x18f   : > { %p415_p4 = pnand %p414_p12, %p408_p13 }
 0x191   : > { %418 = shalt.err (!%p415_p4)
}
 0x192   : > { %313 = dma.vmem_to_hbm [thread:$0]  (%p656_p11), %s604_s7, 16, %s602_s16, %s213_s17  }
 0x193 PF: > { %p324_p9 = scmp.ge.s32.totalorder %s457_s12, 2  ;;  %s237_s3 = sand.u32 1, %s445_s9  }
 0x194   : > { %p657_p1 = scmp.ne.s32.totalorder %s652_s22, 0  ;;  %s238_s4 = scalar_lea.sflag [#allocation4], %s237_s3 }
 0x196   : > { %p320_p3 = pnand %p324_p9, %p657_p1 }
 0x198   : > { %440 = dma.done.wait (!%p320_p3), %s238_s4, 16  }
 0x199   : > { %442 = vsyncadd (!%p320_p3), %s238_s4, 4294967280  ;;  %p15_p5 = scmp.ge.s32.totalorder %s501_s15, 5   ;;  %s658_s9 = smov %s449_s10 }
 0x19a   : > { %s659_s10 = smov %s453_s11  ;;  %s660_s11 = smov %s513_s18 }
 0x19b   : > { %s661_s12 = smov %s501_s15  ;;  %17 = sbr.rel (!%p15_p5) target bundleno = 5 (0x5), region = 76 }
 0x1a2   :  { %242 = vsyncpa [#allocation3], 1 }
 0x1a3   :  { %244 = vsyncpa [#allocation3 + $0x1], 1 }
 0x1a4   :  { %245 = vsyncpa [#allocation4], 1 }
 0x1a5   :  { %247 = vsyncpa [#allocation4 + $0x1], 1 }

</bundles_post_ra>
